<compile_context>
chip_gen: v7x
topology: tpu7x:2x2x1
jax: 0.10.0
libtpu: 0.0.40
codegen_flags: <defaults>
</compile_context>

<pallas_src>
import functools
import math

import jax
import jax.numpy as jnp
from jax import lax
from jax.experimental import pallas as pl
from jax.experimental.pallas import tpu as pltpu

_INV_SQRT2 = 0.7071067811865476
_LN_EPS = 1e-12


# ----------------------------------------------------------------------------- helpers
def _round_up(x, m):
    return (x + m - 1) // m * m


def _pick_tm(M, K, N, dtype, target=256, vmem_budget=24 * 2**20):
    """Pick a row tile: large (feeds the MXU), dtype-aware, VMEM-budgeted, >=2 grid steps."""
    itemsize = jnp.dtype(dtype).itemsize
    min_tm = 16 if itemsize < 4 else 8          # bf16 packs 16 rows per sublane tile
    tm = max(min_tm, min(target, _round_up(M, min_tm)))
    # Prefer a grid of >= 2 steps so both v7x TensorCores get work.
    while tm > min_tm and M < 2 * tm:
        tm //= 2
    # Keep double-buffered x/res/out tiles + the (double-buffered) weight in VMEM.
    def est(t):
        return 2 * (t * K + 2 * t * N + K * N + 3 * N) * itemsize
    while tm > min_tm and est(tm) > vmem_budget:
        tm //= 2
    return max(tm, min_tm)


def _vmem_limit_bytes(tm, K, N, itemsize):
    est = 2 * (tm * K + 2 * tm * N + K * N + 3 * N) * itemsize + (4 << 20)
    # Floor at 32 MiB (default scoped limit), cap at 64 MiB (v7x physical).
    return int(min(64 * 2**20, max(est, 32 * 2**20)))


def _erf_approx(x):
    # Abramowitz & Stegun 7.1.26, |err| < 1.5e-7. Uses only VPU/EUP-friendly ops
    # (abs/sign/exp/recip) that are guaranteed to lower in Mosaic.
    a1, a2, a3, a4, a5 = 0.254829592, -0.284496736, 1.421413741, -1.453152027, 1.061405429
    p = 0.3275911
    s = jnp.sign(x)
    ax = jnp.abs(x)
    t = 1.0 / (1.0 + p * ax)
    poly = ((((a5 * t + a4) * t + a3) * t + a2) * t + a1) * t
    return s * (1.0 - poly * jnp.exp(-ax * ax))


# ----------------------------------------------------------------------------- kernels
def dense_act_kernel(x_ref, w_ref, b_ref, o_ref, *, activation):
    h = jnp.dot(x_ref[...], w_ref[...], preferred_element_type=jnp.float32)
    h = h + b_ref[...].astype(jnp.float32)
    if activation == "gelu":
        # exact-erf GELU (matches torch: x * 0.5 * (1 + erf(x / sqrt(2))))
        h = 0.5 * h * (1.0 + _erf_approx(h * _INV_SQRT2))
    o_ref[...] = h.astype(o_ref.dtype)


def dense_residual_ln_kernel(x_ref, w_ref, b_ref, res_ref, g_ref, be_ref, o_ref, *, eps):
    # dense (MXU, f32 accumulate) + bias + dropout(eval = identity) + residual + LayerNorm
    # TODO(synk): training-mode dropout (pltpu.prng_* + stateful_bernoulli) not wired in.
    h = jnp.dot(x_ref[...], w_ref[...], preferred_element_type=jnp.float32)
    h = h + b_ref[...].astype(jnp.float32)
    h = h + res_ref[...].astype(jnp.float32)
    mean = jnp.mean(h, axis=-1, keepdims=True)
    c = h - mean
    var = jnp.mean(c * c, axis=-1, keepdims=True)
    normed = c * lax.rsqrt(var + eps)
    out = normed * g_ref[...].astype(jnp.float32) + be_ref[...].astype(jnp.float32)
    o_ref[...] = out.astype(o_ref.dtype)


def attn_kernel(q_ref, k_ref, v_ref, mask_ref, o_ref, *, scale):
    # One (batch, head) block: softmax(Q K^T * scale + mask) V, all math in f32.
    q = q_ref[0, 0].astype(jnp.float32)          # (S, D)
    k = k_ref[0, 0].astype(jnp.float32)          # (S, D)
    v = v_ref[0, 0]                              # (S, D)
    s = lax.dot_general(q, k, dimension_numbers=(((1,), (1,)), ((), ())),
                        preferred_element_type=jnp.float32) * scale
    s = s + mask_ref[0, 0].astype(jnp.float32)   # (1, S) additive mask, broadcast over rows
    m = jnp.max(s, axis=-1, keepdims=True)
    e = jnp.exp(s - m)
    p = e / jnp.sum(e, axis=-1, keepdims=True)
    # TODO(synk): attention-probs dropout (training mode) not wired in; identity in eval.
    ctx = jnp.dot(p.astype(v.dtype), v, preferred_element_type=jnp.float32)
    o_ref[0, 0] = ctx.astype(o_ref.dtype)


# ----------------------------------------------------------------------------- wrappers
def _dense(x2d, w, b, *, activation=None, tm_target=256):
    M, K = x2d.shape
    N = w.shape[1]
    tm = _pick_tm(M, K, N, x2d.dtype, tm_target)
    Mp = _round_up(M, tm)
    if Mp != M:
        x2d = jnp.pad(x2d, ((0, Mp - M), (0, 0)))
    out = pl.pallas_call(
        functools.partial(dense_act_kernel, activation=activation),
        out_shape=jax.ShapeDtypeStruct((Mp, N), x2d.dtype),
        grid_spec=pltpu.PrefetchScalarGridSpec(
            num_scalar_prefetch=0,
            grid=(Mp // tm,),
            in_specs=[
                pl.BlockSpec((tm, K), lambda i: (i, 0)),   # activation tile
                pl.BlockSpec((K, N), lambda i: (0, 0)),    # full weight
                pl.BlockSpec((1, N), lambda i: (0, 0)),    # bias
            ],
            out_specs=pl.BlockSpec((tm, N), lambda i: (i, 0)),
        ),
        compiler_params=pltpu.CompilerParams(
            dimension_semantics=("parallel",),
            vmem_limit_bytes=_vmem_limit_bytes(tm, K, N, jnp.dtype(x2d.dtype).itemsize)),
    )(x2d, w, b.reshape(1, N))
    return out[:M] if Mp != M else out


def _dense_residual_ln(x2d, w, b, res2d, gamma, beta, *, eps=_LN_EPS, tm_target=256):
    M, K = x2d.shape
    N = w.shape[1]
    tm = _pick_tm(M, K, N, x2d.dtype, tm_target)
    Mp = _round_up(M, tm)
    if Mp != M:
        pad = ((0, Mp - M), (0, 0))
        x2d = jnp.pad(x2d, pad)
        res2d = jnp.pad(res2d, pad)
    out = pl.pallas_call(
        functools.partial(dense_residual_ln_kernel, eps=eps),
        out_shape=jax.ShapeDtypeStruct((Mp, N), res2d.dtype),
        grid_spec=pltpu.PrefetchScalarGridSpec(
            num_scalar_prefetch=0,
            grid=(Mp // tm,),
            in_specs=[
                pl.BlockSpec((tm, K), lambda i: (i, 0)),   # activation tile
                pl.BlockSpec((K, N), lambda i: (0, 0)),    # full weight
                pl.BlockSpec((1, N), lambda i: (0, 0)),    # bias
                pl.BlockSpec((tm, N), lambda i: (i, 0)),   # residual tile
                pl.BlockSpec((1, N), lambda i: (0, 0)),    # LN gamma
                pl.BlockSpec((1, N), lambda i: (0, 0)),    # LN beta
            ],
            out_specs=pl.BlockSpec((tm, N), lambda i: (i, 0)),
        ),
        compiler_params=pltpu.CompilerParams(
            dimension_semantics=("parallel",),
            vmem_limit_bytes=_vmem_limit_bytes(tm, K, N, jnp.dtype(x2d.dtype).itemsize)),
    )(x2d, w, b.reshape(1, N), res2d, gamma.reshape(1, N), beta.reshape(1, N))
    return out[:M] if Mp != M else out


def _attention_core(q, k, v, mask, *, scale):
    """q,k,v: [B, H, S, D]; mask: additive [B, 1, 1, S]."""
    B, H, S, D = q.shape
    return pl.pallas_call(
        functools.partial(attn_kernel, scale=scale),
        out_shape=jax.ShapeDtypeStruct((B, H, S, D), q.dtype),
        grid_spec=pltpu.PrefetchScalarGridSpec(
            num_scalar_prefetch=0,
            grid=(B, H),
            in_specs=[
                pl.BlockSpec((1, 1, S, D), lambda b, h: (b, h, 0, 0)),
                pl.BlockSpec((1, 1, S, D), lambda b, h: (b, h, 0, 0)),
                pl.BlockSpec((1, 1, S, D), lambda b, h: (b, h, 0, 0)),
                pl.BlockSpec((1, 1, 1, S), lambda b, h: (b, 0, 0, 0)),
            ],
            out_specs=pl.BlockSpec((1, 1, S, D), lambda b, h: (b, h, 0, 0)),
        ),
        compiler_params=pltpu.CompilerParams(
            dimension_semantics=("parallel", "parallel")),
    )(q, k, v, mask)


def bert_layer(hidden_states, attention_mask, params, *, num_heads,
               tm_target=256, compute_dtype=None):
    """Forward pass of BertLayer.

    hidden_states : [B, S, hidden]
    attention_mask: additive mask [B, 1, 1, S] (0 for keep, -10000 for masked)
    params        : weights stored as [in_features, out_features] (transposed
                    relative to torch nn.Linear.weight).
    compute_dtype : e.g. jnp.bfloat16 for the fast MXU path (f32 accumulate/LN).
    """
    cast = (lambda t: t.astype(compute_dtype)) if compute_dtype is not None else (lambda t: t)
    B, S, Hd = hidden_states.shape
    D = Hd // num_heads
    M = B * S

    x2d = cast(hidden_states).reshape(M, Hd)

    # ---- self attention: fused QKV projection (lane-dense 3*Hd output) -------
    w_qkv = cast(jnp.concatenate([params["wq"], params["wk"], params["wv"]], axis=1))
    b_qkv = cast(jnp.concatenate([params["bq"], params["bk"], params["bv"]], axis=0))
    qkv = _dense(x2d, w_qkv, b_qkv, tm_target=tm_target)          # [M, 3*Hd]
    q2d, k2d, v2d = qkv[:, :Hd], qkv[:, Hd:2 * Hd], qkv[:, 2 * Hd:]

    def split_heads(t):
        return t.reshape(B, S, num_heads, D).transpose(0, 2, 1, 3)

    ctx = _attention_core(split_heads(q2d), split_heads(k2d), split_heads(v2d),
                          attention_mask.astype(jnp.float32),
                          scale=1.0 / math.sqrt(D))
    ctx2d = ctx.transpose(0, 2, 1, 3).reshape(M, Hd)

    # ---- BertSelfOutput: dense + residual + LayerNorm (fused) ----------------
    attn_out = _dense_residual_ln(ctx2d, cast(params["wo"]), cast(params["bo"]),
                                  x2d, cast(params["gamma_attn"]), cast(params["beta_attn"]),
                                  tm_target=tm_target)

    # ---- BertIntermediate: dense + GELU (fused) ------------------------------
    inter = _dense(attn_out, cast(params["wi"]), cast(params["bi"]),
                   activation="gelu", tm_target=tm_target)

    # ---- BertOutput: dense + residual + LayerNorm (fused) --------------------
    out = _dense_residual_ln(inter, cast(params["w_out"]), cast(params["b_out"]),
                             attn_out, cast(params["gamma_out"]), cast(params["beta_out"]),
                             tm_target=tm_target)
    return out.reshape(B, S, Hd)


# ----------------------------------------------------------------------------- reference
def reference(hidden_states, attention_mask, params, *, num_heads):
    B, S, Hd = hidden_states.shape
    D = Hd // num_heads
    x = hidden_states

    def dense(t, w, b):
        return jnp.einsum("bsk,kn->bsn", t, w) + b

    def split_heads(t):
        return t.reshape(B, S, num_heads, D).transpose(0, 2, 1, 3)

    def ln(t, g, b):
        u = jnp.mean(t, axis=-1, keepdims=True)
        s = jnp.mean((t - u) ** 2, axis=-1, keepdims=True)
        return g * (t - u) / jnp.sqrt(s + _LN_EPS) + b

    q = split_heads(dense(x, params["wq"], params["bq"]))
    k = split_heads(dense(x, params["wk"], params["bk"]))
    v = split_heads(dense(x, params["wv"], params["bv"]))
    scores = jnp.einsum("bhqd,bhkd->bhqk", q, k) / math.sqrt(D) + attention_mask
    probs = jax.nn.softmax(scores, axis=-1)
    ctx = jnp.einsum("bhqk,bhkd->bhqd", probs, v).transpose(0, 2, 1, 3).reshape(B, S, Hd)

    attn_out = ln(dense(ctx, params["wo"], params["bo"]) + x,
                  params["gamma_attn"], params["beta_attn"])
    inter = dense(attn_out, params["wi"], params["bi"])
    inter = inter * 0.5 * (1.0 + lax.erf(inter / math.sqrt(2.0)))
    out = ln(dense(inter, params["w_out"], params["b_out"]) + attn_out,
             params["gamma_out"], params["beta_out"])
    return out


# ----------------------------------------------------------------------------- main
if __name__ == "__main__":
    # Small, lane-friendly config: hidden=128 (multiple of 128), intermediate=512,
    # 2 heads x 64, batch=2, seq=128.
    B, S, HIDDEN, HEADS, INTER = 2, 128, 128, 2, 512

    ks = jax.random.split(jax.random.PRNGKey(0), 14)

    def pinit(k, shape, scale=0.02):
        return jax.random.normal(k, shape, dtype=jnp.float32) * scale

    params = dict(
        wq=pinit(ks[0], (HIDDEN, HIDDEN)), bq=pinit(ks[1], (HIDDEN,)),
        wk=pinit(ks[2], (HIDDEN, HIDDEN)), bk=pinit(ks[3], (HIDDEN,)),
        wv=pinit(ks[4], (HIDDEN, HIDDEN)), bv=pinit(ks[5], (HIDDEN,)),
        wo=pinit(ks[6], (HIDDEN, HIDDEN)), bo=pinit(ks[7], (HIDDEN,)),
        gamma_attn=jnp.ones((HIDDEN,), jnp.float32),
        beta_attn=jnp.zeros((HIDDEN,), jnp.float32),
        wi=pinit(ks[8], (HIDDEN, INTER)), bi=pinit(ks[9], (INTER,)),
        w_out=pinit(ks[10], (INTER, HIDDEN)), b_out=pinit(ks[11], (HIDDEN,)),
        gamma_out=jnp.ones((HIDDEN,), jnp.float32),
        beta_out=jnp.zeros((HIDDEN,), jnp.float32),
    )

    hidden_states = jax.random.normal(ks[12], (B, S, HIDDEN), dtype=jnp.float32)

    # Additive attention mask [B, 1, 1, S]: batch 0 attends to all, batch 1 masks
    # the last 32 positions (mimics BertModel's (1 - mask) * -10000 extension).
    lengths = jnp.array([S, S - 32])
    keep = (jnp.arange(S)[None, :] < lengths[:, None]).astype(jnp.float32)   # [B, S]
    attention_mask = (1.0 - keep)[:, None, None, :] * -10000.0               # [B, 1, 1, S]

    # f32 run + correctness check against a pure-JAX reference.
    out = bert_layer(hidden_states, attention_mask, params, num_heads=HEADS)
    out = jax.block_until_ready(out)
    ref = reference(hidden_states, attention_mask, params, num_heads=HEADS)
    assert out.shape == (B, S, HIDDEN)
    assert jnp.allclose(out, ref, atol=2e-3, rtol=2e-3), float(jnp.max(jnp.abs(out - ref)))

    # bf16 smoke run: exercises the 16-row sublane minimum and the bf16 MXU path.
    out_bf16 = bert_layer(hidden_states, attention_mask, params,
                          num_heads=HEADS, compute_dtype=jnp.bfloat16)
    out_bf16 = jax.block_until_ready(out_bf16)
    assert out_bf16.shape == (B, S, HIDDEN)
    assert bool(jnp.all(jnp.isfinite(out_bf16.astype(jnp.float32))))

    print("KERNEL_OK")
</pallas_src>

<mosaic_0001>
module attributes {stable_mosaic.version = 11 : i64} {
  func.func @dense_act_kernel(%arg0: i32, %arg1: memref<128x128xf32, #tpu.memory_space<vmem>>, %arg2: memref<128x384xf32, #tpu.memory_space<vmem>>, %arg3: memref<1x384xf32, #tpu.memory_space<vmem>>, %arg4: memref<128x384xf32, #tpu.memory_space<vmem>>) attributes {dimension_semantics = [#tpu.dimension_semantics<parallel>], iteration_bounds = array<i64: 2>, scalar_prefetch = 0 : i64, scratch_operands = 0 : i64, tpu.core_type = #tpu.core_type<tc>, window_params = [{transform_indices = @transform_0, window_bounds = array<i64: 128, 128>}, {pipeline_mode = #tpu.pipeline_mode<synchronous>, transform_indices = @transform_1, window_bounds = array<i64: 128, 384>}, {pipeline_mode = #tpu.pipeline_mode<synchronous>, transform_indices = @transform_2, window_bounds = array<i64: 1, 384>}, {transform_indices = @transform_3, window_bounds = array<i64: 128, 384>}]} {
    %c0 = arith.constant 0 : index
    %c0_0 = arith.constant 0 : index
    %0 = vector.load %arg1[%c0, %c0_0] : memref<128x128xf32, #tpu.memory_space<vmem>>, vector<128x128xf32>
    %c0_1 = arith.constant 0 : index
    %c0_2 = arith.constant 0 : index
    %1 = vector.load %arg2[%c0_1, %c0_2] : memref<128x384xf32, #tpu.memory_space<vmem>>, vector<128x384xf32>
    %cst = arith.constant dense<0.000000e+00> : vector<128x384xf32>
    %2 = tpu.matmul %0, %1, %cst {dimension_numbers = #tpu.dot_dimension_numbers<[1], [0], [0], [1], [0, 0, 1, 1], [], []>} : vector<128x128xf32>, vector<128x384xf32>, vector<128x384xf32> -> vector<128x384xf32>
    %c0_3 = arith.constant 0 : index
    %c0_4 = arith.constant 0 : index
    %3 = vector.load %arg3[%c0_3, %c0_4] : memref<1x384xf32, #tpu.memory_space<vmem>>, vector<1x384xf32>
    %4 = vector.broadcast %3 : vector<1x384xf32> to vector<128x384xf32>
    %5 = arith.addf %2, %4 : vector<128x384xf32>
    %c0_5 = arith.constant 0 : index
    %c0_6 = arith.constant 0 : index
    %6 = vector.load %arg4[%c0_5, %c0_6] : memref<128x384xf32, #tpu.memory_space<vmem>>, vector<128x384xf32>
    tpu.vector_store %arg4[%c0_5, %c0_6], %5 {strides = array<i32>} : memref<128x384xf32, #tpu.memory_space<vmem>>, vector<128x384xf32>,
    return
  }
  func.func @transform_0(%arg0: i32) -> (i32, i32) {
    %c0_i32 = arith.constant 0 : i32
    %c0_i32_0 = arith.constant 0 : i32
    return %arg0, %c0_i32 : i32, i32
  }
  func.func @transform_1(%arg0: i32) -> (i32, i32) {
    %c0_i32 = arith.constant 0 : i32
    %c0_i32_0 = arith.constant 0 : i32
    %c0_i32_1 = arith.constant 0 : i32
    return %c0_i32, %c0_i32_0 : i32, i32
  }
  func.func @transform_2(%arg0: i32) -> (i32, i32) {
    %c0_i32 = arith.constant 0 : i32
    %c0_i32_0 = arith.constant 0 : i32
    %c0_i32_1 = arith.constant 0 : i32
    return %c0_i32, %c0_i32_0 : i32, i32
  }
  func.func @transform_3(%arg0: i32) -> (i32, i32) {
    %c0_i32 = arith.constant 0 : i32
    %c0_i32_0 = arith.constant 0 : i32
    return %arg0, %c0_i32 : i32, i32
  }
}

</mosaic_0001>

<bundles_post_ra>
// kernel: tpu_custom_call.1
= control target key start
LH: loop header
LB: loop body
LE: loop exit
PB: predicated region body
PF: predicated region fallthrough
CT: control target
= control target key end

     0   :  { %8 = vsyncpa [#allocation3], 0  ;;  %s1481_s0 = inlined_call_operand.hbm [shape: f32[256,128], index: 0, kind: input, shape index: {}]   ;;  %s1482_s1 = inlined_call_operand.hbm [shape: f32[128,384], index: 1, kind: input, shape index: {}]   ;;  %s1483_s2 = inlined_call_operand.vmem [shape: f32[1,384], index: 2, kind: input, shape index: {}]   ;;  %s1484_s3 = inlined_call_operand.hbm [shape: f32[256,384], index: 3, kind: output, shape index: {}]  }
   0x1   :  { %10 = vsyncpa [#allocation3 + $0x1], 0 }
   0x2   :  { %11 = vsyncpa [#allocation6], 0 }
   0x3   :  { %12 = vsyncpa [#allocation4], 0 }
   0x4   :  { %14 = vsyncpa [#allocation4 + $0x1], 0  ;;  %s1133_s12 = smov 0   ;;  %s1135_s13 = smov 0  }
   0x5   :  { %s1137_s14 = smov 0   ;;  %s1139_s15 = smov 0  }
   0x6 LB: > { %s1154_s16 = sadd.s32 4294967295, %s1101_s15   ;;  %s739_s17 = sadd.s32 4294967294, %s1101_s15   ;;  %s1101_s15 = sphi %s1139_s15, %s1504_s15   ;;  %s1097_s14 = sphi %s1137_s14, %s1503_s14   ;;  %s1093_s13 = sphi %s1135_s13, %s1502_s13   ;;  %s1089_s12 = sphi %s1133_s12, %s1501_s12  }
   0x7   : > { %p40_p0 = scmp.ne.s32.totalorder %s1093_s13, %s1089_s12  ;;  %p1485_p1 = scmp.eq.s32.totalorder %s1154_s16, 0 }
   0x8   : > { %p112_p3 = scmp.eq.s32.totalorder %s739_s17, 1  ;;  %p740_p5 = scmp.ge.s32.totalorder %s1101_s15, 1 }
   0x9   : > { %p1163_p4 = por %p1485_p1, %p40_p0  ;;  %p119_p7 = scmp.lt.s32.totalorder %s1101_s15, 3 }
   0xa   : > { %p1168_p6 = por %p112_p3, %p40_p0  ;;  %s1103_s21 = smov [#allocation5]  }
   0xb   : > { %s1488_s18 = scalar_select %p1163_p4, 1, 0 }
   0xc   : > { %s1489_s19 = scalar_select %p1168_p6, 1, 0 }
   0xd   : > { %p1173_p8 = pnand %p740_p5, %p119_p7  ;;  %s131_s22 = sshll.u32 %s1103_s21, 4  ;;  %s1177_s22 = int_to_ptr.vmem [resolvable:$true] %s131_s22 }
   0xe   : > { %s1189_s24 = sadd.s32 1, %s1101_s15   ;;  %s27_s25 = sadd.s32 1, %s1097_s14 }
   0xf   : > { %s1490_s20 = scalar_select %p1173_p8, 1, 0 }
  0x10   : > { %p917_p9 = pneg %p1173_p8  ;;  %s24_s26 = ssub.s32 %s1101_s15, %s1189_s24 }
  0x11   : > { %s973_s29 = scalar_lea.hbm %s1482_s1, 6144 }
  0x12   : > { %p1184_p11 = pnand %p917_p9, %p1485_p1  ;;  %p974_p12 = scmp.ne.s32.totalorder %s1482_s1, %s973_s29 }
  0x13   : > { %p980_p5 = scmp.lt.u32.totalorder %s973_s29, %s1482_s1 }
  0x14   : > { %p975_p13 = pneg %p1184_p11 }
  0x16   : > { %p976_p0 = pnand %p975_p13, %p974_p12 }
  0x18   : > { %p977_p3 = pneg %p976_p0 }
  0x1a   : > { %p982_p7 = pnand %p980_p5, %p977_p3 }
  0x1c   : > { %985 = shalt.err (!%p982_p7)
}
  0x1d   : > { %s986_s7 = scalar_lea.vmem %s1177_s22, 6144  ;;  %p994_p2 = scmp.lt.s32.totalorder %s1177_s22, %s1177_s22 }
  0x1e   : > { %p987_p9 = scmp.ne.s32.totalorder %s1177_s22, %s986_s7  ;;  %p995_p6 = scmp.lt.s32.totalorder %s986_s7, %s986_s7 }
  0x20   : > { %p989_p10 = pnand %p987_p9, %p975_p13  ;;  %p996_p4 = por %p995_p6, %p994_p2 }
  0x22   : > { %p990_p1 = pneg %p989_p10 }
  0x24   : > { %p997_p8 = pnand %p996_p4, %p990_p1 }
  0x26   : > { %1000 = shalt.err (!%p997_p8)
}
  0x27   : > { %s1104_s8 = smov 384   ;;  %s1105_s9 = smov 24  }
  0x28   : > { %920 = dma.hbm_to_vmem [thread:$0]  (!%p1184_p11), %s1482_s1, 6144, %s1177_s22, [#allocation6], %s1104_s8, %s1104_s8, %s1105_s9  }
  0x29   : > { %p25_p2 = scmp.eq.s32.totalorder %s24_s26, 0  ;;  %p34_p1 = scmp.ne.s32.totalorder %s1097_s14, %s1093_s13 }
  0x2a   : > { %p35_p4 = scmp.eq.s32.totalorder %s1101_s15, 0  ;;  %p930_p6 = scmp.lt.s32.totalorder %s1101_s15, 2 }
  0x2b   : > { %s1220_s17 = scalar_select %p25_p2, %s1097_s14, %s27_s25  }
  0x2c   : > { %p36_p8 = por %p35_p4, %p34_p1  ;;  %p1492_p10 = scmp.eq.s32.totalorder %s1154_s16, 1 }
  0x2d   : > { %s148_s27 = sand.u32 1, %s1097_s14   ;;  %s754_s28 = sshll.u32 %s1101_s15, 11 }
  0x2e   : > { %p1224_p12 = por %p1492_p10, %p34_p1  ;;  %s743_s29 = sshll.u32 %s148_s27, 7 }
  0x2f   : > { %s1233_s4 = scalar_lea.hbm %s1481_s0, %s754_s28  ;;  %s152_s22 = scalar_lea.vmem [#allocation2], %s743_s29 }
  0x30   : > { %s159_s25 = sshll.u32 %s152_s22, 4  ;;  %p1235_p11 = pnand %p930_p6, %p36_p8  ;;  %s1239_s25 = int_to_ptr.vmem [resolvable:$true] %s159_s25 }
  0x31   : > { %s1241_s5 = scalar_lea.sflag [#allocation3], %s148_s27  ;;  %s1001_s6 = scalar_lea.hbm %s1233_s4, 2048 }
  0x32   : > { %p1002_p13 = scmp.ne.s32.totalorder %s1233_s4, %s1001_s6  ;;  %p1003_p0 = pneg %p1235_p11 }
  0x33   : > { %s1006_s9 = scalar_lea.hbm %s1481_s0, 4096  ;;  %p1007_p7 = scmp.lt.u32.totalorder %s1233_s4, %s1481_s0 }
  0x34   : > { %p1004_p3 = pnand %p1003_p0, %p1002_p13  ;;  %p1008_p9 = scmp.lt.u32.totalorder %s1006_s9, %s1001_s6 }
  0x35   : > { %p1010_p1 = scmp.lt.u32.totalorder %s1001_s6, %s1233_s4 }
  0x36   : > { %p1005_p5 = pneg %p1004_p3  ;;  %p1009_p2 = por %p1008_p9, %p1007_p7 }
  0x38   : > { %p1011_p4 = por %p1010_p1, %p1009_p2 }
  0x3a   : > { %p1012_p6 = pnand %p1011_p4, %p1005_p5 }
  0x3c   : > { %1015 = shalt.err (!%p1012_p6)
}
  0x3d   : > { %s1016_s27 = scalar_lea.vmem %s1239_s25, 2048  ;;  %s1106_s28 = smov [#allocation2]  }
  0x3e   : > { %p1017_p8 = scmp.ne.s32.totalorder %s1239_s25, %s1016_s27  ;;  %s1021_s29 = sshll.u32 %s1106_s28, 4  ;;  %s1022_s29 = int_to_ptr.vmem [resolvable:$false] %s1021_s29 }
  0x3f   : > { %s1023_s23 = scalar_lea.vmem %s1022_s29, 4096  ;;  %p1024_p3 = scmp.lt.s32.totalorder %s1239_s25, %s1022_s29 }
  0x40   : > { %p1019_p10 = pnand %p1017_p8, %p1003_p0  ;;  %p1025_p7 = scmp.lt.s32.totalorder %s1023_s23, %s1016_s27 }
  0x42   : > { %p1020_p13 = pneg %p1019_p10  ;;  %p1026_p9 = por %p1025_p7, %p1024_p3 }
  0x44   : > { %p1027_p2 = pnand %p1026_p9, %p1020_p13 }
  0x46   : > { %1030 = shalt.err (!%p1027_p2)
}
  0x47   : > { %s1107_s30 = smov 128   ;;  %s1108_s22 = smov 8  }
  0x48   : > { %924 = dma.hbm_to_vmem [thread:$0]  (!%p1235_p11), %s1233_s4, 2048, %s1239_s25, %s1241_s5, %s1107_s30, %s1107_s30, %s1108_s22  }
  0x49   : > { %p1495_p0 = scmp.ne.s32.totalorder %s1490_s20, 0 }
  0x4a   : > { %s1272_s6 = sand.u32 (!%p1495_p0), 1, %s1093_s13   ;;  %p1496_p5 = scmp.ne.s32.totalorder (!%p1495_p0), %s1488_s18, 0 }
  0x4b   : > { %171 = sbr.rel (%p1495_p0) target bundleno = 411 (0x19b), region = 32  ;;  %s747_s7 = sshll.u32 (!%p1495_p0), %s1272_s6, 7 }
  0x4c   : > { %s174_s8 = scalar_lea.sflag (!%p1495_p0), [#allocation3], %s1272_s6  ;;  %s1276_s9 = scalar_lea.vmem (!%p1495_p0), [#allocation2], %s747_s7 }
  0x52   : > { %1076 = dma.done.wait (%p1496_p5), %s174_s8, 2048  }
  0x53   : > { %1078 = vsyncadd (%p1496_p5), %s174_s8, 4294965248  ;;  %p1497_p11 = scmp.eq.s32.totalorder %s1154_s16, 0 }
  0x55   : > { %1080 = dma.done.wait (%p1497_p11), [#allocation6], 6144   ;;  %p1498_p1 = pmov %p1497_p11 }
  0x56   : > { %v1109_v0 = vmov 0.0   ;;  %v223_v1 = vld [vmem:[#allocation5 + $0x8] sm:$0xff]  ;;  %v226_v2 = vld [vmem:[#allocation5 + $0x20] sm:$0xff]  ;;  %v225_v5 = vld [vmem:[#allocation5 + $0x18] sm:$0xff]  ;;  %s907_s4 = smul.u32 384, %s1272_s6  ;;  %s1110_s29 = smov [#allocation7]  }
  0x57   : > { %1082 = vsyncadd (%p1498_p1), [#allocation6], 4294961152  ;;  %351 = vmatprep.mubr.f32.mxu0 %v1109_v0  ;;  %v222_v3 = vld [vmem:[#allocation5] sm:$0xff]  ;;  %v843_v4 = vpack.c.bf16 %v226_v2, %v223_v1  ;;  %v229_v6 = vld [vmem:[#allocation5 + $0x38] sm:$0xff]  ;;  %s908_s26 = smul.u32 6144, %s1154_s16  ;;  %s642_s16 = scalar_lea.sflag [#allocation4], %s1272_s6 }
  0x58   : > { %v232_v7 = vld [vmem:[#allocation5 + $0x50] sm:$0xff]  ;;  %v845_v8 = vpack.c.bf16 %v225_v5, %v222_v3  ;;  %v231_v11 = vld [vmem:[#allocation5 + $0x48] sm:$0xff]  ;;  %v238_v13 = vld [vmem:[#allocation5 + $0x80] sm:$0xff]  ;;  %s1332_s25 = scalar_lea.vmem [#allocation7], %s907_s4  ;;  %s1035_s23 = sshll.u32 %s1110_s29, 4  ;;  %s1036_s23 = int_to_ptr.vmem [resolvable:$false] %s1035_s23 }
  0x59   : > { %v847_v9 = vpack.c.bf16 %v232_v7, %v229_v6  ;;  %v228_v10 = vld [vmem:[#allocation5 + $0x30] sm:$0xff]  ;;  %v235_v12 = vld [vmem:[#allocation5 + $0x68] sm:$0xff]  ;;  %844 = vmatprep.subr.bf16.mxu0 %v843_v4  ;;  %v234_v16 = vld [vmem:[#allocation5 + $0x60] sm:$0xff]  ;;  %s656_s5 = sshll.u32 %s1332_s25, 4  ;;  %s1432_s27 = scalar_lea.hbm %s1484_s3, %s908_s26  ;;  %s1434_s5 = int_to_ptr.vmem [resolvable:$true] %s656_s5 }
  0x5a   : > { %846 = vmatpush1.bf16.msra.mxu0 %v845_v8  ;;  %v849_v14 = vpack.c.bf16 %v231_v11, %v228_v10  ;;  %v851_v15 = vpack.c.bf16 %v238_v13, %v235_v12  ;;  %v237_v17 = vld [vmem:[#allocation5 + $0x78] sm:$0xff]  ;;  %v244_v19 = vld [vmem:[#allocation5 + $0xb0] sm:$0xff]  ;;  %v243_v23 = vld [vmem:[#allocation5 + $0xa8] sm:$0xff]  ;;  %s1031_s28 = scalar_lea.vmem %s1434_s5, 6144  ;;  %s1037_s30 = scalar_lea.vmem %s1036_s23, 12288 }
  0x5b   : > { %848 = vmatprep.subr.bf16.mxu0 %v847_v9  ;;  %v241_v18 = vld [vmem:[#allocation5 + $0x98] sm:$0xff]  ;;  %v853_v20 = vpack.c.bf16 %v237_v17, %v234_v16  ;;  %v240_v22 = vld [vmem:[#allocation5 + $0x90] sm:$0xff]  ;;  %v247_v24 = vld [vmem:[#allocation5 + $0xc8] sm:$0xff]  ;;  %p1032_p4 = scmp.ne.s32.totalorder %s1434_s5, %s1031_s28  ;;  %p1038_p10 = scmp.lt.s32.totalorder %s1434_s5, %s1036_s23 }
  0x5c   : > { %v855_v21 = vpack.c.bf16 %v244_v19, %v241_v18  ;;  %v250_v25 = vld [vmem:[#allocation5 + $0xe0] sm:$0xff]  ;;  %v224_v26 = vld [vmem:[#allocation5 + $0x10] sm:$0xff]  ;;  %v227_v27 = vld [vmem:[#allocation5 + $0x28] sm:$0xff]  ;;  %v857_v30 = vpack.c.bf16 %v243_v23, %v240_v22  ;;  %p1039_p13 = scmp.lt.s32.totalorder %s1037_s30, %s1031_s28 }
  0x5d   : > { %v1288_v28 = vld [vmem:[%s1276_s9] sm:$0xff]  ;;  %v875_v32 = vpack.c.bf16 %v227_v27, %v224_v26  ;;  %v233_v33 = vld [vmem:[#allocation5 + $0x58] sm:$0xff]  ;;  %v859_v34 = vpack.c.bf16 %v250_v25, %v247_v24  ;;  %v236_v37 = vld [vmem:[#allocation5 + $0x70] sm:$0xff]  ;;  %v272_v26 = vlaneseq  ;;  %p1033_p6 = pnand %p1032_p4, %p1224_p12 }
  0x5e   : > { %850 = vmatpush1.bf16.msra.mxu0 %v849_v14  ;;  %v230_v29 = vld [vmem:[#allocation5 + $0x40] sm:$0xff]  ;;  %819 = vmatprep.mubr.f32.mxu1 %v1288_v28  ;;  %v249_v35 = vld [vmem:[#allocation5 + $0xd8] sm:$0xff]  ;;  %v239_v38 = vld [vmem:[#allocation5 + $0x88] sm:$0xff]  ;;  %p1040_p3 = por %p1039_p13, %p1038_p10 }
  0x5f   : > { %852 = vmatprep.subr.bf16.mxu0 %v851_v15  ;;  %v246_v31 = vld [vmem:[#allocation5 + $0xc0] sm:$0xff]  ;;  %v879_v36 = vpack.c.bf16 %v233_v33, %v230_v29  ;;  %v253_v39 = vld [vmem:[#allocation5 + $0xf8] sm:$0xff]  ;;  %v256_v40 = vld [vmem:[#allocation5 + $0x110] sm:$0xff]  ;;  %876 = vmatprep.subr.bf16.mxu1 %v875_v32  ;;  %v883_v43 = vpack.c.bf16 %v239_v38, %v236_v37  ;;  %v273_v27 = vshrl.u32 %v272_v26, 7  ;;  %p1034_p8 = pneg %p1033_p6 }
  0x60   : > { %878 = vmatpush3.bf16.msra.mxu1 %v875_v32  ;;  %v861_v41 = vpack.c.bf16 %v249_v35, %v246_v31  ;;  %v252_v42 = vld [vmem:[#allocation5 + $0xf0] sm:$0xff]  ;;  %v863_v44 = vpack.c.bf16 %v256_v40, %v253_v39  ;;  %v255_v45 = vld [vmem:[#allocation5 + $0x108] sm:$0xff]  ;;  %v242_v46 = vld [vmem:[#allocation5 + $0xa0] sm:$0xff] }
  0x61   : > { %880 = vmatprep.subr.bf16.mxu1 %v879_v36  ;;  %v245_v47 = vld [vmem:[#allocation5 + $0xb8] sm:$0xff]  ;;  %v259_v48 = vld [vmem:[#allocation5 + $0x128] sm:$0xff]  ;;  %v262_v49 = vld [vmem:[#allocation5 + $0x140] sm:$0xff]  ;;  %v865_v50 = vpack.c.bf16 %v255_v45, %v252_v42  ;;  %v282_v37 = vsub.s32 2, %v273_v27  ;;  %p1041_p7 = pnand %p1040_p3, %p1034_p8 }
  0x62   : > { %854 = vmatpush1.bf16.msra.mxu0 %v853_v20  ;;  %v258_v51 = vld [vmem:[#allocation5 + $0x120] sm:$0xff]  ;;  %v887_v52 = vpack.c.bf16 %v245_v47, %v242_v46  ;;  %v867_v53 = vpack.c.bf16 %v262_v49, %v259_v48  ;;  %v261_v54 = vld [vmem:[#allocation5 + $0x138] sm:$0xff]  ;;  %v248_v55 = vld [vmem:[#allocation5 + $0xd0] sm:$0xff] }
  0x63   : > { %856 = vmatprep.subr.bf16.mxu0 %v855_v21  ;;  %v251_v56 = vld [vmem:[#allocation5 + $0xe8] sm:$0xff]  ;;  %v265_v57 = vld [vmem:[#allocation5 + $0x158] sm:$0xff]  ;;  %v268_v58 = vld [vmem:[#allocation5 + $0x170] sm:$0xff]  ;;  %v869_v59 = vpack.c.bf16 %v261_v54, %v258_v51 }
  0x64   : > { %882 = vmatpush3.bf16.msra.mxu1 %v879_v36  ;;  %v264_v60 = vld [vmem:[#allocation5 + $0x150] sm:$0xff]  ;;  %v891_v61 = vpack.c.bf16 %v251_v56, %v248_v55  ;;  %v871_v62 = vpack.c.bf16 %v268_v58, %v265_v57  ;;  %v267_v63 = vld [vmem:[#allocation5 + $0x168] sm:$0xff]  ;;  %v254_v1 = vld [vmem:[#allocation5 + $0x100] sm:$0xff] }
  0x65   : > { %884 = vmatprep.subr.bf16.mxu1 %v883_v43  ;;  %v257_v2 = vld [vmem:[#allocation5 + $0x118] sm:$0xff]  ;;  %v873_v3 = vpack.c.bf16 %v267_v63, %v264_v60  ;;  %v260_v5 = vld [vmem:[#allocation5 + $0x130] sm:$0xff]  ;;  %v263_v6 = vld [vmem:[#allocation5 + $0x148] sm:$0xff] }
  0x66   : > { %858 = vmatpush1.bf16.msra.mxu0 %v857_v30  ;;  %v895_v4 = vpack.c.bf16 %v257_v2, %v254_v1  ;;  %v899_v7 = vpack.c.bf16 %v263_v6, %v260_v5  ;;  %v266_v8 = vld [vmem:[#allocation5 + $0x160] sm:$0xff]  ;;  %v269_v9 = vld [vmem:[#allocation5 + $0x178] sm:$0xff]  ;;  %v207_v10 = vld [vmem:[%s1276_s9 + $0x8] sm:$0xff]  ;;  %v278_v30 = vsub.s32 1, %v273_v27 }
  0x67   : > { %860 = vmatprep.subr.bf16.mxu0 %v859_v34  ;;  %v903_v11 = vpack.c.bf16 %v269_v9, %v266_v8  ;;  %v208_v12 = vld [vmem:[%s1276_s9 + $0x10] sm:$0xff]  ;;  %v209_v13 = vld [vmem:[%s1276_s9 + $0x18] sm:$0xff]  ;;  %v210_v14 = vld [vmem:[%s1276_s9 + $0x20] sm:$0xff] }
  0x68   : > { %886 = vmatpush3.bf16.msra.mxu1 %v883_v43  ;;  %v211_v15 = vld [vmem:[%s1276_s9 + $0x28] sm:$0xff]  ;;  %v212_v16 = vld [vmem:[%s1276_s9 + $0x30] sm:$0xff]  ;;  %v213_v17 = vld [vmem:[%s1276_s9 + $0x38] sm:$0xff] }
  0x69   : > { %888 = vmatprep.subr.bf16.mxu1 %v887_v52  ;;  %v214_v18 = vld [vmem:[%s1276_s9 + $0x40] sm:$0xff]  ;;  %v215_v19 = vld [vmem:[%s1276_s9 + $0x48] sm:$0xff]  ;;  %v216_v20 = vld [vmem:[%s1276_s9 + $0x50] sm:$0xff] }
  0x6a   : > { %862 = vmatpush1.bf16.msra.mxu0 %v861_v41  ;;  %v217_v21 = vld [vmem:[%s1276_s9 + $0x58] sm:$0xff]  ;;  %v218_v22 = vld [vmem:[%s1276_s9 + $0x60] sm:$0xff]  ;;  %v219_v23 = vld [vmem:[%s1276_s9 + $0x68] sm:$0xff] }
  0x6b   : > { %864 = vmatprep.subr.bf16.mxu0 %v863_v44  ;;  %v220_v24 = vld [vmem:[%s1276_s9 + $0x70] sm:$0xff]  ;;  %v221_v25 = vld [vmem:[%s1276_s9 + $0x78] sm:$0xff]  ;;  %v270_v29 = vld [vmem:[%s1483_s2] sm:$0x7] }
  0x6c   : > { %890 = vmatpush3.bf16.msra.mxu1 %v887_v52  ;;  %v1328_v32 = vrot.slane %v270_v29, %v278_v30  ;;  %v1340_v42 = vrot.slane %v270_v29, %v282_v37 }
  0x6d   : > { %892 = vmatprep.subr.bf16.mxu1 %v891_v61 }
  0x6e   : > { %866 = vmatpush1.bf16.msra.mxu0 %v865_v50 }
  0x6f   : > { %868 = vmatprep.subr.bf16.mxu0 %v867_v53 }
  0x70   : > { %894 = vmatpush3.bf16.msra.mxu1 %v891_v61 }
  0x71   : > { %896 = vmatprep.subr.bf16.mxu1 %v895_v4 }
  0x72   : > { %870 = vmatpush1.bf16.msra.mxu0 %v869_v59 }
  0x73   : > { %872 = vmatprep.subr.bf16.mxu0 %v871_v62 }
  0x74   : > { %898 = vmatpush3.bf16.msra.mxu1 %v895_v4 }
  0x75   : > { %900 = vmatprep.subr.bf16.mxu1 %v899_v7 }
  0x76   : > { %874 = vmatpush1.bf16.msra.mxu0 %v873_v3 }
  0x78   : > { %902 = vmatpush3.bf16.msra.mxu1 %v899_v7 }
  0x79   : > { %352 = vmatmul.mubr.f32.vlgmr.msra.gmra.mrb[0].mxu0 %v1288_v28  ;;  %904 = vmatprep.subr.bf16.mxu1 %v903_v11  ;;  %v274_v28 = vsub.s32 0, %v273_v27 }
  0x7a   : > { %357 = vmatprep.mubr.f32.mxu0 %v1109_v0 }
  0x7b   : > { %v1326_v31 = vrot.slane %v270_v29, %v274_v28 }
  0x7c   : > { %906 = vmatpush3.bf16.msra.mxu1 %v903_v11 }
  0x7d   : > { %358 = vmatmul.mubr.f32.gmra.mrb[2].mxu0 %v207_v10 }
  0x7e   : > { %363 = vmatprep.mubr.f32.mxu0 %v1109_v0 }
  0x7f   : > { %820 = vmatmul.mubr.f32.vlgmr.msra.gmra.mrb[0].mxu1 %v207_v10 }
  0x80   : > { %822 = vmatprep.mubr.f32.mxu1 %v208_v12 }
  0x81   : > { %364 = vmatmul.mubr.f32.gmra.mrb[4].mxu0 %v208_v12 }
  0x82   : > { %369 = vmatprep.mubr.f32.mxu0 %v1109_v0 }
  0x83   : > { %823 = vmatmul.mubr.f32.gmra.mrb[2].mxu1 %v209_v13 }
  0x84   : > { %825 = vmatprep.mubr.f32.mxu1 %v210_v14 }
  0x85   : > { %370 = vmatmul.mubr.f32.gmra.mrb[6].mxu0 %v209_v13 }
  0x86   : > { %375 = vmatprep.mubr.f32.mxu0 %v1109_v0 }
  0x87   : > { %826 = vmatmul.mubr.f32.gmra.mrb[4].mxu1 %v211_v15 }
  0x88   : > { %828 = vmatprep.mubr.f32.mxu1 %v212_v16 }
  0x89   : > { %376 = vmatmul.mubr.f32.gmra.mrb[8].mxu0 %v210_v14 }
  0x8a   : > { %381 = vmatprep.mubr.f32.mxu0 %v1109_v0 }
  0x8b   : > { %829 = vmatmul.mubr.f32.gmra.mrb[6].mxu1 %v213_v17 }
  0x8c   : > { %831 = vmatprep.mubr.f32.mxu1 %v214_v18 }
  0x8d   : > { %382 = vmatmul.mubr.f32.gmra.mrb[10].mxu0 %v211_v15 }
  0x8e   : > { %387 = vmatprep.mubr.f32.mxu0 %v1109_v0 }
  0x8f   : > { %832 = vmatmul.mubr.f32.gmra.mrb[8].mxu1 %v215_v19 }
  0x90   : > { %834 = vmatprep.mubr.f32.mxu1 %v216_v20 }
  0x91   : > { %388 = vmatmul.mubr.f32.gmra.mrb[12].mxu0 %v212_v16 }
  0x92   : > { %393 = vmatprep.mubr.f32.mxu0 %v1109_v0 }
  0x93   : > { %835 = vmatmul.mubr.f32.gmra.mrb[10].mxu1 %v217_v21 }
  0x94   : > { %837 = vmatprep.mubr.f32.mxu1 %v218_v22 }
  0x95   : > { %394 = vmatmul.mubr.f32.gmra.mrb[14].mxu0 %v213_v17 }
  0x96   : > { %399 = vmatprep.mubr.f32.mxu0 %v1109_v0 }
  0x97   : > { %838 = vmatmul.mubr.f32.gmra.mrb[12].mxu1 %v219_v23 }
  0x98   : > { %840 = vmatprep.mubr.f32.mxu1 %v220_v24 }
  0x99   : > { %400 = vmatmul.mubr.f32.gmra.mrb[16].mxu0 %v214_v18 }
  0x9a   : > { %405 = vmatprep.mubr.f32.mxu0 %v1109_v0 }
  0x9b   : > { %841 = vmatmul.mubr.f32.gmra.mrb[14].mxu1 %v221_v25 }
  0x9d   : > { %406 = vmatmul.mubr.f32.gmra.mrb[18].mxu0 %v215_v19 }
  0x9e   : > { %411 = vmatprep.mubr.f32.mxu0 %v1109_v0 }
  0xa1   : > { %412 = vmatmul.mubr.f32.gmra.mrb[20].mxu0 %v216_v20 }
  0xa2   : > { %417 = vmatprep.mubr.f32.mxu0 %v1109_v0 }
  0xa5   : > { %418 = vmatmul.mubr.f32.gmra.mrb[22].mxu0 %v217_v21 }
  0xa6   : > { %423 = vmatprep.mubr.f32.mxu0 %v1109_v0 }
  0xa9   : > { %424 = vmatmul.mubr.f32.gmra.mrb[24].mxu0 %v218_v22 }
  0xaa   : > { %429 = vmatprep.mubr.f32.mxu0 %v1109_v0 }
  0xad   : > { %430 = vmatmul.mubr.f32.gmra.mrb[26].mxu0 %v219_v23 }
  0xae   : > { %435 = vmatprep.mubr.f32.mxu0 %v1109_v0 }
  0xb1   : > { %436 = vmatmul.mubr.f32.gmra.mrb[28].mxu0 %v220_v24 }
  0xb2   : > { %441 = vmatprep.mubr.f32.mxu0 %v1109_v0 }
  0xb5   : > { %442 = vmatmul.mubr.f32.gmra.mrb[30].mxu0 %v221_v25 }
 0x14c   : > { %v353_v33 = vpop.f32.mrb[0].mxu0 }
 0x14d   : > { %v354_v34 = vadd.f32 %v353_v33, %v1326_v31  ;;  %v355_v35 = vpop.f32.mrb[1].mxu0 }
 0x14e   : > { %v356_v0 = vadd.f32 %v355_v35, %v1328_v32 }
 0x14f   : > { %593 = vst [vmem:[%s1332_s25] sm:$0xff] %v354_v34 }
 0x150   : > { %594 = vst [vmem:[%s1332_s25 + $0x8] sm:$0xff] %v356_v0  ;;  %v359_v36 = vpop.f32.mrb[2].mxu0 }
 0x151   : > { %v360_v38 = vadd.f32 %v359_v36, %v1326_v31  ;;  %v361_v39 = vpop.f32.mrb[3].mxu0 }
 0x152   : > { %v362_v40 = vadd.f32 %v361_v39, %v1328_v32  ;;  %v821_v46 = vpop.f32.mrb[0].mxu1 }
 0x153   : > { %596 = vst [vmem:[%s1332_s25 + $0x18] sm:$0xff] %v360_v38  ;;  %v520_v48 = vadd.f32 %v821_v46, %v1340_v42  ;;  %v514_v49 = vpop.f32.mrb[1].mxu1 }
 0x154   : > { %597 = vst [vmem:[%s1332_s25 + $0x20] sm:$0xff] %v362_v40  ;;  %v365_v41 = vpop.f32.mrb[4].mxu0  ;;  %v515_v52 = vadd.f32 %v514_v49, %v1340_v42 }
 0x155   : > { %v366_v43 = vadd.f32 %v365_v41, %v1326_v31  ;;  %v367_v44 = vpop.f32.mrb[5].mxu0  ;;  %598 = vst [vmem:[%s1332_s25 + $0x28] sm:$0xff] %v520_v48 }
 0x156   : > { %v368_v45 = vadd.f32 %v367_v44, %v1328_v32  ;;  %595 = vst [vmem:[%s1332_s25 + $0x10] sm:$0xff] %v515_v52  ;;  %v824_v54 = vpop.f32.mrb[2].mxu1 }
 0x157   : > { %599 = vst [vmem:[%s1332_s25 + $0x30] sm:$0xff] %v366_v43  ;;  %v530_v56 = vadd.f32 %v824_v54, %v1340_v42  ;;  %v524_v57 = vpop.f32.mrb[3].mxu1 }
 0x158   : > { %600 = vst [vmem:[%s1332_s25 + $0x38] sm:$0xff] %v368_v45  ;;  %v371_v47 = vpop.f32.mrb[6].mxu0  ;;  %v525_v60 = vadd.f32 %v524_v57, %v1340_v42 }
 0x159   : > { %v372_v50 = vadd.f32 %v371_v47, %v1326_v31  ;;  %v373_v51 = vpop.f32.mrb[7].mxu0  ;;  %604 = vst [vmem:[%s1332_s25 + $0x58] sm:$0xff] %v530_v56 }
 0x15a   : > { %v374_v53 = vadd.f32 %v373_v51, %v1328_v32  ;;  %601 = vst [vmem:[%s1332_s25 + $0x40] sm:$0xff] %v525_v60  ;;  %v827_v62 = vpop.f32.mrb[4].mxu1 }
 0x15b   : > { %602 = vst [vmem:[%s1332_s25 + $0x48] sm:$0xff] %v372_v50  ;;  %v540_v1 = vadd.f32 %v827_v62, %v1340_v42  ;;  %v534_v2 = vpop.f32.mrb[5].mxu1 }
 0x15c   : > { %603 = vst [vmem:[%s1332_s25 + $0x50] sm:$0xff] %v374_v53  ;;  %v377_v55 = vpop.f32.mrb[8].mxu0  ;;  %v535_v5 = vadd.f32 %v534_v2, %v1340_v42 }
 0x15d   : > { %v378_v58 = vadd.f32 %v377_v55, %v1326_v31  ;;  %v379_v59 = vpop.f32.mrb[9].mxu0  ;;  %610 = vst [vmem:[%s1332_s25 + $0x88] sm:$0xff] %v540_v1 }
 0x15e   : > { %v380_v61 = vadd.f32 %v379_v59, %v1328_v32  ;;  %607 = vst [vmem:[%s1332_s25 + $0x70] sm:$0xff] %v535_v5  ;;  %v830_v7 = vpop.f32.mrb[6].mxu1 }
 0x15f   : > { %605 = vst [vmem:[%s1332_s25 + $0x60] sm:$0xff] %v378_v58  ;;  %v550_v9 = vadd.f32 %v830_v7, %v1340_v42  ;;  %v544_v10 = vpop.f32.mrb[7].mxu1 }
 0x160   : > { %606 = vst [vmem:[%s1332_s25 + $0x68] sm:$0xff] %v380_v61  ;;  %v383_v63 = vpop.f32.mrb[10].mxu0  ;;  %v545_v13 = vadd.f32 %v544_v10, %v1340_v42 }
 0x161   : > { %v384_v3 = vadd.f32 %v383_v63, %v1326_v31  ;;  %v385_v4 = vpop.f32.mrb[11].mxu0  ;;  %616 = vst [vmem:[%s1332_s25 + $0xb8] sm:$0xff] %v550_v9 }
 0x162   : > { %v386_v6 = vadd.f32 %v385_v4, %v1328_v32  ;;  %613 = vst [vmem:[%s1332_s25 + $0xa0] sm:$0xff] %v545_v13  ;;  %v833_v15 = vpop.f32.mrb[8].mxu1 }
 0x163   : > { %608 = vst [vmem:[%s1332_s25 + $0x78] sm:$0xff] %v384_v3  ;;  %v560_v17 = vadd.f32 %v833_v15, %v1340_v42  ;;  %v554_v18 = vpop.f32.mrb[9].mxu1 }
 0x164   : > { %609 = vst [vmem:[%s1332_s25 + $0x80] sm:$0xff] %v386_v6  ;;  %v389_v8 = vpop.f32.mrb[12].mxu0  ;;  %v555_v21 = vadd.f32 %v554_v18, %v1340_v42 }
 0x165   : > { %v390_v11 = vadd.f32 %v389_v8, %v1326_v31  ;;  %v391_v12 = vpop.f32.mrb[13].mxu0  ;;  %622 = vst [vmem:[%s1332_s25 + $0xe8] sm:$0xff] %v560_v17 }
 0x166   : > { %v392_v14 = vadd.f32 %v391_v12, %v1328_v32  ;;  %619 = vst [vmem:[%s1332_s25 + $0xd0] sm:$0xff] %v555_v21  ;;  %v836_v23 = vpop.f32.mrb[10].mxu1 }
 0x167   : > { %611 = vst [vmem:[%s1332_s25 + $0x90] sm:$0xff] %v390_v11  ;;  %v570_v25 = vadd.f32 %v836_v23, %v1340_v42  ;;  %v564_v26 = vpop.f32.mrb[11].mxu1 }
 0x168   : > { %612 = vst [vmem:[%s1332_s25 + $0x98] sm:$0xff] %v392_v14  ;;  %v395_v16 = vpop.f32.mrb[14].mxu0  ;;  %v565_v29 = vadd.f32 %v564_v26, %v1340_v42 }
 0x169   : > { %v396_v19 = vadd.f32 %v395_v16, %v1326_v31  ;;  %v397_v20 = vpop.f32.mrb[15].mxu0  ;;  %628 = vst [vmem:[%s1332_s25 + $0x118] sm:$0xff] %v570_v25 }
 0x16a   : > { %v398_v22 = vadd.f32 %v397_v20, %v1328_v32  ;;  %625 = vst [vmem:[%s1332_s25 + $0x100] sm:$0xff] %v565_v29  ;;  %v839_v33 = vpop.f32.mrb[12].mxu1 }
 0x16b   : > { %614 = vst [vmem:[%s1332_s25 + $0xa8] sm:$0xff] %v396_v19  ;;  %v580_v35 = vadd.f32 %v839_v33, %v1340_v42  ;;  %v574_v0 = vpop.f32.mrb[13].mxu1 }
 0x16c   : > { %615 = vst [vmem:[%s1332_s25 + $0xb0] sm:$0xff] %v398_v22  ;;  %v401_v24 = vpop.f32.mrb[16].mxu0  ;;  %v575_v38 = vadd.f32 %v574_v0, %v1340_v42 }
 0x16d   : > { %v402_v27 = vadd.f32 %v401_v24, %v1326_v31  ;;  %v403_v28 = vpop.f32.mrb[17].mxu0  ;;  %634 = vst [vmem:[%s1332_s25 + $0x148] sm:$0xff] %v580_v35 }
 0x16e   : > { %v404_v30 = vadd.f32 %v403_v28, %v1328_v32  ;;  %631 = vst [vmem:[%s1332_s25 + $0x130] sm:$0xff] %v575_v38  ;;  %v842_v40 = vpop.f32.mrb[14].mxu1 }
 0x16f   : > { %617 = vst [vmem:[%s1332_s25 + $0xc0] sm:$0xff] %v402_v27  ;;  %v590_v43 = vadd.f32 %v842_v40, %v1340_v42  ;;  %v584_v44 = vpop.f32.mrb[15].mxu1 }
 0x170   : > { %618 = vst [vmem:[%s1332_s25 + $0xc8] sm:$0xff] %v404_v30  ;;  %v407_v34 = vpop.f32.mrb[18].mxu0  ;;  %v585_v47 = vadd.f32 %v584_v44, %v1340_v42 }
 0x171   : > { %v408_v36 = vadd.f32 %v407_v34, %v1326_v31  ;;  %v409_v37 = vpop.f32.mrb[19].mxu0  ;;  %640 = vst [vmem:[%s1332_s25 + $0x178] sm:$0xff] %v590_v43 }
 0x172   : > { %v410_v39 = vadd.f32 %v409_v37, %v1328_v32  ;;  %637 = vst [vmem:[%s1332_s25 + $0x160] sm:$0xff] %v585_v47 }
 0x173   : > { %620 = vst [vmem:[%s1332_s25 + $0xd8] sm:$0xff] %v408_v36 }
 0x174   : > { %621 = vst [vmem:[%s1332_s25 + $0xe0] sm:$0xff] %v410_v39  ;;  %v413_v41 = vpop.f32.mrb[20].mxu0 }
 0x175   : > { %v414_v45 = vadd.f32 %v413_v41, %v1326_v31  ;;  %v415_v46 = vpop.f32.mrb[21].mxu0 }
 0x176   : > { %v416_v48 = vadd.f32 %v415_v46, %v1328_v32 }
 0x177   : > { %623 = vst [vmem:[%s1332_s25 + $0xf0] sm:$0xff] %v414_v45 }
 0x178   : > { %624 = vst [vmem:[%s1332_s25 + $0xf8] sm:$0xff] %v416_v48  ;;  %v419_v49 = vpop.f32.mrb[22].mxu0 }
 0x179   : > { %v420_v50 = vadd.f32 %v419_v49, %v1326_v31  ;;  %v421_v51 = vpop.f32.mrb[23].mxu0 }
 0x17a   : > { %v422_v52 = vadd.f32 %v421_v51, %v1328_v32 }
 0x17b   : > { %626 = vst [vmem:[%s1332_s25 + $0x108] sm:$0xff] %v420_v50 }
 0x17c   : > { %627 = vst [vmem:[%s1332_s25 + $0x110] sm:$0xff] %v422_v52  ;;  %v425_v42 = vpop.f32.mrb[24].mxu0 }
 0x17d   : > { %v426_v53 = vadd.f32 %v425_v42, %v1326_v31  ;;  %v427_v54 = vpop.f32.mrb[25].mxu0 }
 0x17e   : > { %v428_v55 = vadd.f32 %v427_v54, %v1328_v32 }
 0x17f   : > { %629 = vst [vmem:[%s1332_s25 + $0x120] sm:$0xff] %v426_v53 }
 0x180   : > { %630 = vst [vmem:[%s1332_s25 + $0x128] sm:$0xff] %v428_v55  ;;  %v431_v56 = vpop.f32.mrb[26].mxu0 }
 0x181   : > { %v432_v57 = vadd.f32 %v431_v56, %v1326_v31  ;;  %v433_v58 = vpop.f32.mrb[27].mxu0 }
 0x182   : > { %v434_v59 = vadd.f32 %v433_v58, %v1328_v32 }
 0x183   : > { %632 = vst [vmem:[%s1332_s25 + $0x138] sm:$0xff] %v432_v57 }
 0x184   : > { %633 = vst [vmem:[%s1332_s25 + $0x140] sm:$0xff] %v434_v59  ;;  %v437_v60 = vpop.f32.mrb[28].mxu0 }
 0x185   : > { %v438_v61 = vadd.f32 %v437_v60, %v1326_v31  ;;  %v439_v62 = vpop.f32.mrb[29].mxu0 }
 0x186   : > { %v440_v63 = vadd.f32 %v439_v62, %v1328_v32 }
 0x187   : > { %635 = vst [vmem:[%s1332_s25 + $0x150] sm:$0xff] %v438_v61 }
 0x188   : > { %636 = vst [vmem:[%s1332_s25 + $0x158] sm:$0xff] %v440_v63  ;;  %v443_v1 = vpop.f32.mrb[30].mxu0 }
 0x189   : > { %v444_v2 = vadd.f32 %v443_v1, %v1326_v31  ;;  %v445_v3 = vpop.f32.mrb[31].mxu0 }
 0x18a   : > { %v446_v4 = vadd.f32 %v445_v3, %v1328_v32 }
 0x18b   : > { %638 = vst [vmem:[%s1332_s25 + $0x168] sm:$0xff] %v444_v2 }
 0x18c   : > { %639 = vst [vmem:[%s1332_s25 + $0x170] sm:$0xff] %v446_v4 }
 0x18d   : > { %1044 = shalt.err (!%p1041_p7)
}
 0x18e   : > { %s1045_s22 = scalar_lea.hbm %s1432_s27, 6144  ;;  %s1049_s9 = scalar_lea.hbm %s1484_s3, 12288 }
 0x18f   : > { %p1046_p9 = scmp.ne.s32.totalorder %s1432_s27, %s1045_s22  ;;  %p1050_p5 = scmp.lt.u32.totalorder %s1432_s27, %s1484_s3 }
 0x190   : > { %p1051_p11 = scmp.lt.u32.totalorder %s1049_s9, %s1045_s22  ;;  %p1053_p4 = scmp.lt.u32.totalorder %s1045_s22, %s1432_s27 }
 0x191   : > { %p1047_p2 = pnand %p1046_p9, %p1224_p12 }
 0x192   : > { %p1052_p1 = por %p1051_p11, %p1050_p5 }
 0x193   : > { %p1048_p0 = pneg %p1047_p2 }
 0x194   : > { %p1054_p6 = por %p1053_p4, %p1052_p1 }
 0x196   : > { %p1055_p8 = pnand %p1054_p6, %p1048_p0 }
 0x198   : > { %1058 = shalt.err (!%p1055_p8)
}
 0x199   : > { %s1111_s4 = smov 384   ;;  %s1112_s25 = smov 24  }
 0x19a   : > { %915 = dma.vmem_to_hbm [thread:$0]  (%p1224_p12), %s1434_s5, 6144, %s1432_s27, %s642_s16, %s1111_s4, %s1111_s4, %s1112_s25  }
 0x19b PF: > { %s671_s26 = sand.u32 1, %s1089_s12   ;;  %p1499_p10 = scmp.ne.s32.totalorder %s1489_s19, 0 }
 0x19c   : > { %p1500_p13 = scmp.ge.s32.totalorder %s1101_s15, 2  ;;  %s672_s10 = scalar_lea.sflag [#allocation4], %s671_s26 }
 0x19e   : > { %p926_p3 = pnand %p1500_p13, %p1499_p10 }
 0x1a0   : > { %1084 = dma.done.wait (!%p926_p3), %s672_s10, 6144  }
 0x1a1   : > { %1086 = vsyncadd (!%p926_p3), %s672_s10, 4294961152  ;;  %p17_p7 = scmp.ge.s32.totalorder %s1189_s24, 4   ;;  %s1501_s12 = smov %s1093_s13 }
 0x1a2   : > { %s1502_s13 = smov %s1097_s14  ;;  %s1503_s14 = smov %s1220_s17 }
 0x1a3   : > { %s1504_s15 = smov %s1189_s24  ;;  %19 = sbr.rel (!%p17_p7) target bundleno = 6 (0x6), region = 81 }
 0x1aa   :  { %677 = vsyncpa [#allocation3], 1 }
 0x1ab   :  { %679 = vsyncpa [#allocation3 + $0x1], 1 }
 0x1ac   :  { %680 = vsyncpa [#allocation6], 1 }
 0x1ad   :  { %681 = vsyncpa [#allocation4], 1 }
 0x1ae   :  { %683 = vsyncpa [#allocation4 + $0x1], 1 }

</bundles_post_ra>
